<compile_context>
chip_gen: v7x
topology: tpu7x:2x2x1
jax: 0.10.0
libtpu: 0.0.40
codegen_flags: <defaults>
</compile_context>

<pallas_src>
import math
import jax
import jax.numpy as jnp
from jax.experimental import pallas as pl
from jax.experimental.pallas import tpu as pltpu

BATCH = 2
SEQ_LEN = 16
EMB_SIZE = 32
NUM_HEADS = 4
HEAD_DIM = EMB_SIZE // NUM_HEADS


# ----------------------------- fused MHA kernel ------------------------------
def make_mha_kernel(B, S, E, H):
    d = E // H

    def kernel(x_ref, wqkv_ref, bqkv_ref, wo_ref, bo_ref, o_ref):
        x = x_ref[...]                                               # (B*S, E) f32

        # One fused QKV projection: (B*S, E) @ (E, 3E) + (1, 3E)
        qkv = jnp.dot(x, wqkv_ref[...],
                      preferred_element_type=jnp.float32) + bqkv_ref[...]

        def to_heads(t):
            # (B*S, H*d) -> (H, B*S, d) via static lane slices, then a pure
            # row-major reshape to (H*B, S, d); group index g = h*B + b.
            hs = jnp.stack([t[:, h * d:(h + 1) * d] for h in range(H)], axis=0)
            return hs.reshape(H * B, S, d)

        q = to_heads(qkv[:, :E])          # 1/sqrt(E) already folded into Wq/bq
        k = to_heads(qkv[:, E:2 * E])
        v = to_heads(qkv[:, 2 * E:3 * E])

        # scaled dot-product attention, all f32
        s = jnp.einsum('gqd,gkd->gqk', q, k,
                       preferred_element_type=jnp.float32)           # (H*B,S,S)
        m = jnp.max(s, axis=-1, keepdims=True)
        p = jnp.exp(s - m)
        att = p * pl.reciprocal(jnp.sum(p, axis=-1, keepdims=True), approx=True)
        # att_drop is identity in eval mode.

        o = jnp.einsum('gqk,gkd->gqd', att, v,
                       preferred_element_type=jnp.float32)           # (H*B,S,d)

        # (H*B, S, d) -> (B*S, H*d): undo head stacking (heads back onto lanes)
        o = o.reshape(H, B * S, d)
        o = jnp.concatenate([o[h] for h in range(H)], axis=-1)       # (B*S, E)

        # output projection: single (B*S, E) @ (E, E) matmul + bias
        out = jnp.dot(o, wo_ref[...],
                      preferred_element_type=jnp.float32) + bo_ref[...]
        o_ref[...] = out.astype(o_ref.dtype)

    return kernel


def multi_head_attention(x, params):
    """x: (B, S, E) float32 -> (B, S, E) float32."""
    B, S, E = x.shape
    H = NUM_HEADS
    inv_scale = 1.0 / math.sqrt(E)        # reference: score / emb_size ** 0.5

    # One-time host-side weight prep: fold the logit scale into Wq/bq and fuse
    # the three projections into a single (E, 3E) weight + (1, 3E) bias.
    wqkv = jnp.concatenate(
        [params['wq'] * inv_scale, params['wk'], params['wv']], axis=1)   # (E, 3E)
    bqkv = jnp.concatenate(
        [params['bq'] * inv_scale, params['bk'], params['bv']]).reshape(1, 3 * E)
    wo = params['wo']                                                     # (E, E)
    bo = params['bo'].reshape(1, E)

    x2 = x.reshape(B * S, E)              # flatten batch into matmul rows

    out2 = pl.pallas_call(
        make_mha_kernel(B, S, E, H),
        out_shape=jax.ShapeDtypeStruct((B * S, E), jnp.float32),
    )(x2, wqkv, bqkv, wo, bo)

    return out2.reshape(B, S, E)


# ----------------------------- pure-JAX reference ----------------------------
def mha_reference(x, params):
    B, S, E = x.shape
    H = NUM_HEADS
    d = E // H
    q = x @ params['wq'] + params['bq']
    k = x @ params['wk'] + params['bk']
    v = x @ params['wv'] + params['bv']

    def split(t):                      # 'b n (h d) -> b h n d'
        return t.reshape(B, S, H, d).transpose(0, 2, 1, 3)

    qh, kh, vh = split(q), split(k), split(v)
    score = jnp.einsum('bhqd,bhkd->bhqk', qh, kh) / (E ** 0.5)
    att = jax.nn.softmax(score, axis=-1)
    out = jnp.einsum('bhqk,bhkd->bhqd', att, vh)
    out = out.transpose(0, 2, 1, 3).reshape(B, S, E)   # 'b h n d -> b n (h d)'
    return out @ params['wo'] + params['bo']


# ----------------------------- main -------------------------------------------
if __name__ == "__main__":
    key = jax.random.PRNGKey(0)
    kx, kq, kk, kv, ko, kbq, kbk, kbv, kbo = jax.random.split(key, 9)

    scale = 0.2
    params = {
        'wq': scale * jax.random.normal(kq, (EMB_SIZE, EMB_SIZE), jnp.float32),
        'wk': scale * jax.random.normal(kk, (EMB_SIZE, EMB_SIZE), jnp.float32),
        'wv': scale * jax.random.normal(kv, (EMB_SIZE, EMB_SIZE), jnp.float32),
        'wo': scale * jax.random.normal(ko, (EMB_SIZE, EMB_SIZE), jnp.float32),
        'bq': scale * jax.random.normal(kbq, (EMB_SIZE,), jnp.float32),
        'bk': scale * jax.random.normal(kbk, (EMB_SIZE,), jnp.float32),
        'bv': scale * jax.random.normal(kbv, (EMB_SIZE,), jnp.float32),
        'bo': scale * jax.random.normal(kbo, (EMB_SIZE,), jnp.float32),
    }
    x = jax.random.normal(kx, (BATCH, SEQ_LEN, EMB_SIZE), dtype=jnp.float32)

    out = jax.block_until_ready(multi_head_attention(x, params))
    assert out.shape == (BATCH, SEQ_LEN, EMB_SIZE), out.shape
    assert bool(jnp.all(jnp.isfinite(out)))

    ref = jax.block_until_ready(mha_reference(x, params))
    # all-f32 matmuls; only the approx EUP reciprocal in the softmax denom
    # introduces (tiny) extra error vs the reference
    assert bool(jnp.allclose(out, ref, atol=5e-3, rtol=5e-3)), \
        float(jnp.max(jnp.abs(out - ref)))

    print("KERNEL_OK")
</pallas_src>

<mosaic_0001>
module attributes {stable_mosaic.version = 11 : i64} {
  func.func @kernel(%arg0: memref<32x32xf32, #tpu.memory_space<vmem>>, %arg1: memref<32x96xf32, #tpu.memory_space<vmem>>, %arg2: memref<1x96xf32, #tpu.memory_space<vmem>>, %arg3: memref<32x32xf32, #tpu.memory_space<vmem>>, %arg4: memref<1x32xf32, #tpu.memory_space<vmem>>, %arg5: memref<32x32xf32, #tpu.memory_space<vmem>>) attributes {dimension_semantics = [], scalar_prefetch = 0 : i64, scratch_operands = 0 : i64, tpu.core_type = #tpu.core_type<tc>} {
    %c0 = arith.constant 0 : index
    %c0_0 = arith.constant 0 : index
    %0 = vector.load %arg0[%c0, %c0_0] : memref<32x32xf32, #tpu.memory_space<vmem>>, vector<32x32xf32>
    %c0_1 = arith.constant 0 : index
    %c0_2 = arith.constant 0 : index
    %1 = vector.load %arg1[%c0_1, %c0_2] : memref<32x96xf32, #tpu.memory_space<vmem>>, vector<32x96xf32>
    %cst = arith.constant dense<0.000000e+00> : vector<32x96xf32>
    %2 = tpu.matmul %0, %1, %cst {dimension_numbers = #tpu.dot_dimension_numbers<[1], [0], [0], [1], [0, 0, 1, 1], [], []>} : vector<32x32xf32>, vector<32x96xf32>, vector<32x96xf32> -> vector<32x96xf32>
    %c0_3 = arith.constant 0 : index
    %c0_4 = arith.constant 0 : index
    %3 = vector.load %arg2[%c0_3, %c0_4] : memref<1x96xf32, #tpu.memory_space<vmem>>, vector<1x96xf32>
    %4 = vector.broadcast %3 : vector<1x96xf32> to vector<32x96xf32>
    %5 = arith.addf %2, %4 : vector<32x96xf32>
    %6 = vector.extract_strided_slice %5 {offsets = [0, 0], sizes = [32, 32], strides = [1, 1]} : vector<32x96xf32> to vector<32x32xf32>
    %7 = vector.extract_strided_slice %6 {offsets = [0, 0], sizes = [32, 8], strides = [1, 1]} : vector<32x32xf32> to vector<32x8xf32>
    %8 = vector.extract_strided_slice %6 {offsets = [0, 8], sizes = [32, 8], strides = [1, 1]} : vector<32x32xf32> to vector<32x8xf32>
    %9 = vector.extract_strided_slice %6 {offsets = [0, 16], sizes = [32, 8], strides = [1, 1]} : vector<32x32xf32> to vector<32x8xf32>
    %10 = vector.extract_strided_slice %6 {offsets = [0, 24], sizes = [32, 8], strides = [1, 1]} : vector<32x32xf32> to vector<32x8xf32>
    %11 = vector.shape_cast %7 : vector<32x8xf32> to vector<1x32x8xf32>
    %12 = vector.shape_cast %8 : vector<32x8xf32> to vector<1x32x8xf32>
    %13 = vector.shape_cast %9 : vector<32x8xf32> to vector<1x32x8xf32>
    %14 = vector.shape_cast %10 : vector<32x8xf32> to vector<1x32x8xf32>
    %15 = tpu.concatenate %11, %12, %13, %14 in 0 : vector<1x32x8xf32>, vector<1x32x8xf32>, vector<1x32x8xf32>, vector<1x32x8xf32> -> vector<4x32x8xf32>
    %16 = vector.shape_cast %15 : vector<4x32x8xf32> to vector<8x16x8xf32>
    %17 = vector.extract_strided_slice %5 {offsets = [0, 32], sizes = [32, 32], strides = [1, 1]} : vector<32x96xf32> to vector<32x32xf32>
    %18 = vector.extract_strided_slice %17 {offsets = [0, 0], sizes = [32, 8], strides = [1, 1]} : vector<32x32xf32> to vector<32x8xf32>
    %19 = vector.extract_strided_slice %17 {offsets = [0, 8], sizes = [32, 8], strides = [1, 1]} : vector<32x32xf32> to vector<32x8xf32>
    %20 = vector.extract_strided_slice %17 {offsets = [0, 16], sizes = [32, 8], strides = [1, 1]} : vector<32x32xf32> to vector<32x8xf32>
    %21 = vector.extract_strided_slice %17 {offsets = [0, 24], sizes = [32, 8], strides = [1, 1]} : vector<32x32xf32> to vector<32x8xf32>
    %22 = vector.shape_cast %18 : vector<32x8xf32> to vector<1x32x8xf32>
    %23 = vector.shape_cast %19 : vector<32x8xf32> to vector<1x32x8xf32>
    %24 = vector.shape_cast %20 : vector<32x8xf32> to vector<1x32x8xf32>
    %25 = vector.shape_cast %21 : vector<32x8xf32> to vector<1x32x8xf32>
    %26 = tpu.concatenate %22, %23, %24, %25 in 0 : vector<1x32x8xf32>, vector<1x32x8xf32>, vector<1x32x8xf32>, vector<1x32x8xf32> -> vector<4x32x8xf32>
    %27 = vector.shape_cast %26 : vector<4x32x8xf32> to vector<8x16x8xf32>
    %28 = vector.extract_strided_slice %5 {offsets = [0, 64], sizes = [32, 32], strides = [1, 1]} : vector<32x96xf32> to vector<32x32xf32>
    %29 = vector.extract_strided_slice %28 {offsets = [0, 0], sizes = [32, 8], strides = [1, 1]} : vector<32x32xf32> to vector<32x8xf32>
    %30 = vector.extract_strided_slice %28 {offsets = [0, 8], sizes = [32, 8], strides = [1, 1]} : vector<32x32xf32> to vector<32x8xf32>
    %31 = vector.extract_strided_slice %28 {offsets = [0, 16], sizes = [32, 8], strides = [1, 1]} : vector<32x32xf32> to vector<32x8xf32>
    %32 = vector.extract_strided_slice %28 {offsets = [0, 24], sizes = [32, 8], strides = [1, 1]} : vector<32x32xf32> to vector<32x8xf32>
    %33 = vector.shape_cast %29 : vector<32x8xf32> to vector<1x32x8xf32>
    %34 = vector.shape_cast %30 : vector<32x8xf32> to vector<1x32x8xf32>
    %35 = vector.shape_cast %31 : vector<32x8xf32> to vector<1x32x8xf32>
    %36 = vector.shape_cast %32 : vector<32x8xf32> to vector<1x32x8xf32>
    %37 = tpu.concatenate %33, %34, %35, %36 in 0 : vector<1x32x8xf32>, vector<1x32x8xf32>, vector<1x32x8xf32>, vector<1x32x8xf32> -> vector<4x32x8xf32>
    %38 = vector.shape_cast %37 : vector<4x32x8xf32> to vector<8x16x8xf32>
    "tpu.trace_start"() <{level = 10 : i32, message = "gqd,gkd->gqk"}> : () -> ()
    %cst_5 = arith.constant dense<0.000000e+00> : vector<8x16x16xf32>
    %39 = tpu.matmul %16, %27, %cst_5 {dimension_numbers = #tpu.dot_dimension_numbers<[2], [2], [1], [1], [0, 0, 0, 1, 1, 1], [0], [0]>} : vector<8x16x8xf32>, vector<8x16x8xf32>, vector<8x16x16xf32> -> vector<8x16x16xf32>
    "tpu.trace_stop"() : () -> ()
    %cst_6 = arith.constant dense<0xFF800000> : vector<8x16xf32>
    %40 = vector.multi_reduction <maximumf>, %39, %cst_6 [2] : vector<8x16x16xf32> to vector<8x16xf32>
    %41 = vector.shape_cast %40 : vector<8x16xf32> to vector<8x16x1xf32>
    %42 = vector.broadcast %41 : vector<8x16x1xf32> to vector<8x16x16xf32>
    %43 = arith.subf %39, %42 : vector<8x16x16xf32>
    %44 = math.exp %43 : vector<8x16x16xf32>
    %cst_7 = arith.constant dense<0.000000e+00> : vector<8x16xf32>
    %45 = vector.multi_reduction <add>, %44, %cst_7 [2] : vector<8x16x16xf32> to vector<8x16xf32>
    %46 = vector.shape_cast %45 : vector<8x16xf32> to vector<8x16x1xf32>
    %47 = tpu.reciprocal %46 {approx = true} : vector<8x16x1xf32> -> vector<8x16x1xf32>
    %48 = vector.broadcast %47 : vector<8x16x1xf32> to vector<8x16x16xf32>
    %49 = arith.mulf %44, %48 : vector<8x16x16xf32>
    "tpu.trace_start"() <{level = 10 : i32, message = "gqk,gkd->gqd"}> : () -> ()
    %cst_8 = arith.constant dense<0.000000e+00> : vector<8x16x8xf32>
    %50 = tpu.matmul %49, %38, %cst_8 {dimension_numbers = #tpu.dot_dimension_numbers<[2], [1], [1], [2], [0, 0, 0, 1, 1, 2], [0], [0]>} : vector<8x16x16xf32>, vector<8x16x8xf32>, vector<8x16x8xf32> -> vector<8x16x8xf32>
    "tpu.trace_stop"() : () -> ()
    %51 = vector.shape_cast %50 : vector<8x16x8xf32> to vector<4x32x8xf32>
    %52 = vector.extract_strided_slice %51 {offsets = [0, 0, 0], sizes = [1, 32, 8], strides = [1, 1, 1]} : vector<4x32x8xf32> to vector<1x32x8xf32>
    %53 = vector.shape_cast %52 : vector<1x32x8xf32> to vector<32x8xf32>
    %54 = vector.extract_strided_slice %51 {offsets = [1, 0, 0], sizes = [1, 32, 8], strides = [1, 1, 1]} : vector<4x32x8xf32> to vector<1x32x8xf32>
    %55 = vector.shape_cast %54 : vector<1x32x8xf32> to vector<32x8xf32>
    %56 = vector.extract_strided_slice %51 {offsets = [2, 0, 0], sizes = [1, 32, 8], strides = [1, 1, 1]} : vector<4x32x8xf32> to vector<1x32x8xf32>
    %57 = vector.shape_cast %56 : vector<1x32x8xf32> to vector<32x8xf32>
    %58 = vector.extract_strided_slice %51 {offsets = [3, 0, 0], sizes = [1, 32, 8], strides = [1, 1, 1]} : vector<4x32x8xf32> to vector<1x32x8xf32>
    %59 = vector.shape_cast %58 : vector<1x32x8xf32> to vector<32x8xf32>
    %60 = tpu.concatenate %53, %55, %57, %59 in 1 : vector<32x8xf32>, vector<32x8xf32>, vector<32x8xf32>, vector<32x8xf32> -> vector<32x32xf32>
    %c0_9 = arith.constant 0 : index
    %c0_10 = arith.constant 0 : index
    %61 = vector.load %arg3[%c0_9, %c0_10] : memref<32x32xf32, #tpu.memory_space<vmem>>, vector<32x32xf32>
    %cst_11 = arith.constant dense<0.000000e+00> : vector<32x32xf32>
    %62 = tpu.matmul %60, %61, %cst_11 {dimension_numbers = #tpu.dot_dimension_numbers<[1], [0], [0], [1], [0, 0, 1, 1], [], []>} : vector<32x32xf32>, vector<32x32xf32>, vector<32x32xf32> -> vector<32x32xf32>
    %c0_12 = arith.constant 0 : index
    %c0_13 = arith.constant 0 : index
    %63 = vector.load %arg4[%c0_12, %c0_13] : memref<1x32xf32, #tpu.memory_space<vmem>>, vector<1x32xf32>
    %64 = vector.broadcast %63 : vector<1x32xf32> to vector<32x32xf32>
    %65 = arith.addf %62, %64 : vector<32x32xf32>
    %c0_14 = arith.constant 0 : index
    %c0_15 = arith.constant 0 : index
    %66 = vector.load %arg5[%c0_14, %c0_15] : memref<32x32xf32, #tpu.memory_space<vmem>>, vector<32x32xf32>
    tpu.vector_store %arg5[%c0_14, %c0_15], %65 {strides = array<i32>} : memref<32x32xf32, #tpu.memory_space<vmem>>, vector<32x32xf32>,
    return
  }
}

</mosaic_0001>

<bundles_post_ra>
// kernel: tpu_custom_call.1
= control target key start
LH: loop header
LB: loop body
LE: loop exit
PB: predicated region body
PF: predicated region fallthrough
CT: control target
= control target key end

     0   :  { %10 = vsyncpa [#allocation3], 0  ;;  %s3034_s0 = inlined_call_operand.hbm [shape: f32[32,32], index: 0, kind: input, shape index: {}]   ;;  %s3035_s1 = inlined_call_operand.hbm [shape: f32[32,96], index: 1, kind: input, shape index: {}]   ;;  %s3036_s2 = inlined_call_operand.vmem [shape: f32[1,96], index: 2, kind: input, shape index: {}]   ;;  %s3037_s3 = inlined_call_operand.hbm [shape: f32[32,32], index: 3, kind: input, shape index: {}]   ;;  %s3038_s4 = inlined_call_operand.vmem [shape: f32[1,32], index: 4, kind: input, shape index: {}]   ;;  %s3039_s5 = inlined_call_operand.hbm [shape: f32[32,32], index: 5, kind: output, shape index: {}]  }
   0x1   :  { %11 = vsyncpa [#allocation6], 0 }
   0x2   :  { %12 = vsyncpa [#allocation4], 0  ;;  %s2589_s18 = smov [#allocation5]   ;;  %s2590_s20 = smov [#allocation2]  }
   0x3   :  { %s30_s19 = sshll.u32 %s2589_s18, 4  ;;  %s18_s21 = sshll.u32 %s2590_s20, 4  ;;  %s31_s19 = int_to_ptr.vmem [resolvable:$true] %s30_s19  ;;  %s2632_s21 = int_to_ptr.vmem [resolvable:$true] %s18_s21 }
   0x4   :  { %s2495_s24 = scalar_lea.hbm %s3035_s1, 512 }
   0x5   :  { %p2496_p0 = scmp.ne.s32.totalorder %s3035_s1, %s2495_s24  ;;  %p2499_p1 = scmp.lt.u32.totalorder %s2495_s24, %s3035_s1 }
   0x7   :  { %p2501_p2 = pnand %p2499_p1, %p2496_p0 }
   0x9   :  { %2504 = shalt.err (!%p2501_p2)
}
   0xa   :  { %s2505_s29 = scalar_lea.vmem %s31_s19, 512  ;;  %p2510_p4 = scmp.lt.s32.totalorder %s31_s19, %s31_s19 }
   0xb   :  { %p2506_p3 = scmp.ne.s32.totalorder %s31_s19, %s2505_s29  ;;  %p2511_p5 = scmp.lt.s32.totalorder %s2505_s29, %s2505_s29 }
   0xd   :  { %p2512_p6 = por %p2511_p5, %p2510_p4 }
   0xf   :  { %p2513_p7 = pnand %p2512_p6, %p2506_p3 }
  0x11   :  { %2516 = shalt.err (!%p2513_p7)
}
  0x12   :  { %s2591_s30 = smov 128   ;;  %s2592_s6 = smov 8  }
  0x13   :  { %36 = dma.hbm_to_vmem [thread:$0]  %s3035_s1, 512, %s31_s19, [#allocation6], %s2591_s30, %s2591_s30, %s2592_s6  }
  0x14   :  { %s2517_s11 = scalar_lea.hbm %s3034_s0, 512 }
  0x15   :  { %p2518_p8 = scmp.ne.s32.totalorder %s3034_s0, %s2517_s11  ;;  %p2521_p9 = scmp.lt.u32.totalorder %s2517_s11, %s3034_s0 }
  0x17   :  { %p2523_p10 = pnand %p2521_p9, %p2518_p8 }
  0x19   :  { %2526 = shalt.err (!%p2523_p10)
}
  0x1a   :  { %s2527_s16 = scalar_lea.vmem %s2632_s21, 512  ;;  %p2532_p12 = scmp.lt.s32.totalorder %s2632_s21, %s2632_s21 }
  0x1b   :  { %p2528_p11 = scmp.ne.s32.totalorder %s2632_s21, %s2527_s16  ;;  %p2533_p13 = scmp.lt.s32.totalorder %s2527_s16, %s2527_s16 }
  0x1d   :  { %p2534_p0 = por %p2533_p13, %p2532_p12 }
  0x1f   :  { %p2535_p1 = pnand %p2534_p0, %p2528_p11 }
  0x21   :  { %2538 = shalt.err (!%p2535_p1)
}
  0x22   :  { %24 = dma.hbm_to_vmem [thread:$0]  %s3034_s0, 512, %s2632_s21, [#allocation3], %s2591_s30, %s2591_s30, %s2592_s6  }
  0x23   :  { %s2593_s18 = smov [#allocation7]   ;;  %s2539_s23 = scalar_lea.hbm %s3037_s3, 512 }
  0x24   :  { %s44_s19 = sshll.u32 %s2593_s18, 4  ;;  %p2540_p2 = scmp.ne.s32.totalorder %s3037_s3, %s2539_s23  ;;  %s45_s19 = int_to_ptr.vmem [resolvable:$true] %s44_s19 }
  0x25   :  { %p2543_p3 = scmp.lt.u32.totalorder %s2539_s23, %s3037_s3 }
  0x27   :  { %p2545_p4 = pnand %p2543_p3, %p2540_p2 }
  0x29   :  { %2548 = shalt.err (!%p2545_p4)
}
  0x2a   :  { %s2549_s28 = scalar_lea.vmem %s45_s19, 512  ;;  %p2554_p6 = scmp.lt.s32.totalorder %s45_s19, %s45_s19 }
  0x2b   :  { %p2550_p5 = scmp.ne.s32.totalorder %s45_s19, %s2549_s28  ;;  %p2555_p7 = scmp.lt.s32.totalorder %s2549_s28, %s2549_s28 }
  0x2d   :  { %p2556_p8 = por %p2555_p7, %p2554_p6 }
  0x2f   :  { %p2557_p9 = pnand %p2556_p8, %p2550_p5 }
  0x31   :  { %2560 = shalt.err (!%p2557_p9)
}
  0x32   :  { %50 = dma.hbm_to_vmem [thread:$0]  %s3037_s3, 512, %s45_s19, [#allocation6], %s2591_s30, %s2591_s30, %s2592_s6  }
  0x33   :  { %2583 = dma.done.wait [#allocation3], 512  }
  0x34   :  { %2584 = vsyncadd [#allocation3], 4294966784 }
  0x35   :  { %2585 = dma.done.wait [#allocation6], 1024  }
  0x36   :  { %2586 = vsyncadd [#allocation6], 4294966272  ;;  %vm77_vm0 = vcmask 261120   ;;  %v66_v0 = vld [vmem:[#allocation5] sm:$0xff]  ;;  %v67_v1 = vld [vmem:[#allocation5 + $0x8] sm:$0xff]  ;;  %vm207_vm1 = vcmask 64512  }
  0x37   :  { %v68_v2 = vld [vmem:[#allocation5 + $0x10] sm:$0xff]  ;;  %v2242_v3 = vpack.c.bf16 %v67_v1, %v66_v0  ;;  %v69_v4 = vld [vmem:[#allocation5 + $0x18] sm:$0xff]  ;;  %v62_v5 = vld [vmem:[#allocation2] sm:$0xff]  ;;  %s2594_s7 = smov 120   ;;  %s2596_s8 = smov 104   ;;  %vm900_vm3 = vcmask 130048  }
  0x38   :  { %v2246_v6 = vpack.c.bf16 %v69_v4, %v68_v2  ;;  %2110 = vmatprep.mubr.msk.f32.mxu1 %vm77_vm0, %v62_v5  ;;  %v63_v7 = vld [vmem:[#allocation2 + $0x8] sm:$0xff]  ;;  %v64_v8 = vld [vmem:[#allocation2 + $0x10] sm:$0xff]  ;;  %v65_v9 = vld [vmem:[#allocation2 + $0x18] sm:$0xff]  ;;  %s2597_s9 = smov 96   ;;  %s2598_s10 = smov 64   ;;  %vm1829_vm4 = vcmask 195584  }
  0x39   :  { %2243 = vmatprep.subr.bf16.mxu1 %v2242_v3  ;;  %v1964_v10 = vld [vmem:[%s3036_s2] ss:$0 sm:$0xff]  ;;  %s2595_s2 = smov 112   ;;  %vm2749_vm2 = vmpackc.low %vm207_vm1, %vm207_vm1  ;;  %s2599_s11 = smov 16  }
  0x3a   :  { %2245 = vmatpush3.bf16.msra.mxu1 %v2242_v3  ;;  %s2600_s12 = smov 24   ;;  %s2601_s15 = smov [#allocation8]  }
  0x3b   :  { %2247 = vmatprep.subr.bf16.mxu1 %v2246_v6  ;;  %s1951_s16 = sshll.u32 %s2601_s15, 4  ;;  %s1952_s16 = int_to_ptr.vmem [resolvable:$true] %s1951_s16 }
  0x3c   :  { %p2566_p11 = scmp.lt.s32.totalorder %s1952_s16, %s1952_s16 }
  0x3e   :  { %2249 = vmatpush3.bf16.msra.mxu1 %v2246_v6 }
  0x41   :  { %2111 = vmatmul.mubr.msk.f32.vlgmr.msra.gmra.mrb[0].mxu1 %vm77_vm0, %v63_v7 }
  0x42   :  { %2113 = vmatprep.mubr.msk.f32.mxu1 %vm77_vm0, %v64_v8 }
  0x45   :  { %2114 = vmatmul.mubr.msk.f32.gmra.mrb[2].mxu1 %vm77_vm0, %v65_v9 }
 0x114   :  { %v2112_v11 = vpop.f32.mrb[0].mxu1 }
 0x115   :  { %v156_v12 = vpop.f32.mrb[1].mxu1  ;;  %v162_v17 = vadd.f32 %v2112_v11, %v1964_v10 }
 0x116   :  { %v157_v13 = vadd.f32 %v1964_v10, %v156_v12 }
 0x118   :  { %v2115_v14 = vpop.f32.mrb[2].mxu1  ;;  %179 = vrot.lane.b32.xlu0 %v157_v13, %s2594_s7  ;;  %2120 = vmatprep.mubr.msk.f32.mxu1 %vm207_vm1, %v157_v13  ;;  %v2351_v19 = vpack.i.bf16 %v162_v17, %v157_v13 }
 0x119   :  { %v2692_v15 = vadd.f32 %v2115_v14, %v1964_v10  ;;  %v166_v16 = vpop.f32.mrb[3].mxu1 }
 0x11a   :  { %v167_v18 = vadd.f32 %v1964_v10, %v166_v16 }
 0x11b   :  { %185 = vrot.lane.b32.xlu1 %v2692_v15, %s2594_s7 }
 0x11c   :  { %2127 = vmatprep.mubr.msk.f32.mxu0 %vm207_vm1, %v167_v18  ;;  %181 = vrot.lane.b32.xlu0 %v162_v17, %s2594_s7  ;;  %v2356_v20 = vpack.i.bf16 %v2692_v15, %v167_v18 }
 0x11f   :  { %183 = vrot.lane.b32.xlu1 %v167_v18, %s2594_s7 }
 0x120   :  { %187 = vrot.lane.b32.xlu0 %v157_v13, %s2595_s2 }
 0x123   :  { %189 = vrot.lane.b32.xlu1 %v162_v17, %s2595_s2 }
 0x124   :  { %191 = vrot.lane.b32.xlu0 %v167_v18, %s2595_s2 }
 0x127   :  { %193 = vrot.lane.b32.xlu1 %v2692_v15, %s2595_s2 }
 0x128   :  { %195 = vrot.lane.b32.xlu0 %v157_v13, %s2596_s8 }
 0x12b   :  { %197 = vrot.lane.b32.xlu1 %v162_v17, %s2596_s8 }
 0x12c   :  { %199 = vrot.lane.b32.xlu0 %v167_v18, %s2596_s8 }
 0x12f   :  { %201 = vrot.lane.b32.xlu1 %v2692_v15, %s2596_s8 }
 0x130   :  { %2352 = vrot.lane.b32.xlu0 %v2351_v19, %s2597_s9 }
 0x133   :  { %2357 = vrot.lane.b32.xlu1 %v2356_v20, %s2597_s9 }
 0x18a   :  { %v180_v21 = vpop.permute.xlu0 %179 }
 0x18d   :  { %v2701_v22 = vpop.permute.xlu1 %185 }
 0x18e   :  { %v2703_v23 = vpop.permute.xlu0 %181 }
 0x18f   :  { %v2361_v24 = vpack.i.bf16 %v2703_v23, %v180_v21 }
 0x191   :  { %v184_v25 = vpop.permute.xlu1 %183  ;;  %2362 = vrot.lane.b32.xlu0 %v2361_v24, %s2597_s9 }
 0x192   :  { %v2366_v26 = vpack.i.bf16 %v2701_v22, %v184_v25  ;;  %v188_v27 = vpop.permute.xlu0 %187 }
 0x194   :  { %2367 = vrot.lane.b32.xlu1 %v2366_v26, %s2597_s9 }
 0x195   :  { %v2709_v28 = vpop.permute.xlu1 %189 }
 0x196   :  { %v2712_v29 = vpack.i.bf16 %v2709_v28, %v188_v27  ;;  %v2714_v30 = vpop.permute.xlu0 %191 }
 0x198   :  { %2372 = vrot.lane.b32.xlu0 %v2712_v29, %s2597_s9 }
 0x199   :  { %v2718_v31 = vpop.permute.xlu1 %193 }
 0x19a   :  { %v2722_v32 = vpack.i.bf16 %v2718_v31, %v2714_v30  ;;  %v2724_v33 = vpop.permute.xlu0 %195 }
 0x19c   :  { %2377 = vrot.lane.b32.xlu1 %v2722_v32, %s2597_s9 }
 0x19d   :  { %v2728_v34 = vpop.permute.xlu1 %197 }
 0x19e   :  { %v2732_v35 = vpack.i.bf16 %v2728_v34, %v2724_v33  ;;  %v2734_v36 = vpop.permute.xlu0 %199 }
 0x1a0   :  { %2382 = vrot.lane.b32.xlu0 %v2732_v35, %s2597_s9 }
 0x1a1   :  { %v2738_v37 = vpop.permute.xlu1 %201 }
 0x1a2   :  { %v2742_v38 = vpack.i.bf16 %v2738_v37, %v2734_v36  ;;  %v2353_v39 = vpop.permute.xlu0 %2352 }
 0x1a3   :  { %v2355_v40 = vunpack.i.h.bf16 %v2353_v39  ;;  %v2354_v41 = vunpack.i.l.bf16 %v2353_v39 }
 0x1a4   :  { %2397 = vrot.lane.b32.xlu0 %v2356_v20, %s2598_s10  ;;  %2387 = vrot.lane.b32.xlu1 %v2742_v38, %s2597_s9 }
 0x1a5   :  { %v2250_v43 = vpack.c.bf16 %v2355_v40, %v2354_v41  ;;  %v2358_v44 = vpop.permute.xlu1 %2357 }
 0x1a6   :  { %v2360_v45 = vunpack.i.h.bf16 %v2358_v44  ;;  %v2359_v46 = vunpack.i.l.bf16 %v2358_v44 }
 0x1a7   :  { %2252 = vmatprep.subr.msk.bf16.mxu1 %vm2749_vm2, %v2250_v43 }
 0x1a8   :  { %2392 = vrot.lane.b32.xlu1 %v2351_v19, %s2598_s10  ;;  %2255 = vmatpush3.bf16.xpose.msk.msra.mxu1 %vm2749_vm2, %v2250_v43  ;;  %v2256_v47 = vpack.c.bf16 %v2360_v45, %v2359_v46 }
 0x1aa   :  { %2258 = vmatprep.subr.msk.bf16.mxu0 %vm2749_vm2, %v2256_v47 }
 0x1ab   :  { %2261 = vmatpush3.bf16.xpose.msk.msra.mxu0 %vm2749_vm2, %v2256_v47 }
 0x1ac   :  { %2402 = vrot.lane.b32.xlu1 %v2361_v24, %s2598_s10 }
 0x1af   :  { %2121 = vmatmul.mubr.msk.f32.vlgmr.msra.gmra.mrb[4].mxu1 %vm207_vm1, %v162_v17 }
 0x1b0   :  { %2407 = vrot.lane.b32.xlu1 %v2366_v26, %s2598_s10  ;;  %2134 = vmatprep.mubr.msk.f32.mxu1 %vm207_vm1, %v180_v21 }
 0x1b2   :  { %2128 = vmatmul.mubr.msk.f32.vlgmr.msra.gmra.mrb[0].mxu0 %vm207_vm1, %v2692_v15 }
 0x1b3   :  { %2141 = vmatprep.mubr.msk.f32.mxu0 %vm207_vm1, %v184_v25 }
 0x203   :  { %v2363_v48 = vpop.permute.xlu0 %2362 }
 0x204   :  { %v2365_v49 = vunpack.i.h.bf16 %v2363_v48  ;;  %v2364_v50 = vunpack.i.l.bf16 %v2363_v48 }
 0x206   :  { %v2262_v51 = vpack.c.bf16 %v2365_v49, %v2364_v50  ;;  %v2368_v52 = vpop.permute.xlu1 %2367 }
 0x207   :  { %v2370_v53 = vunpack.i.h.bf16 %v2368_v52  ;;  %v2369_v54 = vunpack.i.l.bf16 %v2368_v52 }
 0x208   :  { %2264 = vmatprep.subr.msk.bf16.mxu1 %vm2749_vm2, %v2262_v51 }
 0x209   :  { %v2268_v55 = vpack.c.bf16 %v2370_v53, %v2369_v54  ;;  %2267 = vmatpush3.bf16.xpose.msk.msra.mxu1 %vm2749_vm2, %v2262_v51 }
 0x20a   :  { %v2373_v56 = vpop.permute.xlu0 %2372 }
 0x20b   :  { %v2375_v57 = vunpack.i.h.bf16 %v2373_v56  ;;  %v2374_v58 = vunpack.i.l.bf16 %v2373_v56  ;;  %2270 = vmatprep.subr.msk.bf16.mxu0 %vm2749_vm2, %v2268_v55 }
 0x20c   :  { %2273 = vmatpush3.bf16.xpose.msk.msra.mxu0 %vm2749_vm2, %v2268_v55 }
 0x20d   :  { %v2274_v59 = vpack.c.bf16 %v2375_v57, %v2374_v58 }
 0x20e   :  { %v2378_v60 = vpop.permute.xlu1 %2377 }
 0x20f   :  { %v2380_v61 = vunpack.i.h.bf16 %v2378_v60  ;;  %v2379_v62 = vunpack.i.l.bf16 %v2378_v60  ;;  %2276 = vmatprep.subr.msk.bf16.mxu1 %vm2749_vm2, %v2274_v59 }
 0x210   :  { %2135 = vmatmul.mubr.msk.f32.vlgmr.msra.gmra.mrb[6].mxu1 %vm207_vm1, %v2703_v23 }
 0x211   :  { %v2280_v63 = vpack.c.bf16 %v2380_v61, %v2379_v62  ;;  %2279 = vmatpush3.bf16.xpose.msk.msra.mxu1 %vm2749_vm2, %v2274_v59  ;;  %2148 = vmatprep.mubr.msk.f32.mxu1 %vm207_vm1, %v188_v27 }
 0x212   :  { %v2383_v0 = vpop.permute.xlu0 %2382 }
 0x213   :  { %v2385_v1 = vunpack.i.h.bf16 %v2383_v0  ;;  %v2384_v2 = vunpack.i.l.bf16 %v2383_v0  ;;  %2142 = vmatmul.mubr.msk.f32.vlgmr.msra.gmra.mrb[2].mxu0 %vm207_vm1, %v2701_v22  ;;  %2282 = vmatprep.subr.msk.bf16.mxu0 %vm2749_vm2, %v2280_v63 }
 0x214   :  { %2285 = vmatpush3.bf16.xpose.msk.msra.mxu0 %vm2749_vm2, %v2280_v63  ;;  %2155 = vmatprep.mubr.msk.f32.mxu0 %vm207_vm1, %v2714_v30 }
 0x215   :  { %v2286_v3 = vpack.c.bf16 %v2385_v1, %v2384_v2 }
 0x216   :  { %v2388_v4 = vpop.permute.xlu1 %2387  ;;  %v2398_v8 = vpop.permute.xlu0 %2397 }
 0x217   :  { %v2390_v5 = vunpack.i.h.bf16 %v2388_v4  ;;  %v2389_v6 = vunpack.i.l.bf16 %v2388_v4  ;;  %2288 = vmatprep.subr.msk.bf16.mxu1 %vm2749_vm2, %v2286_v3  ;;  %v2400_v12 = vunpack.i.h.bf16 %v2398_v8  ;;  %v2399_v13 = vunpack.i.l.bf16 %v2398_v8 }
 0x218   :  { %2149 = vmatmul.mubr.msk.f32.vlgmr.msra.gmra.mrb[8].mxu1 %vm207_vm1, %v2709_v28 }
 0x219   :  { %v2292_v7 = vpack.c.bf16 %v2390_v5, %v2389_v6  ;;  %2291 = vmatpush3.bf16.xpose.msk.msra.mxu1 %vm2749_vm2, %v2286_v3  ;;  %2162 = vmatprep.mubr.msk.f32.mxu1 %vm207_vm1, %v2724_v33  ;;  %v2808_v18 = vpack.c.bf16 %v2400_v12, %v2399_v13 }
 0x21a   :  { %v2393_v9 = vpop.permute.xlu1 %2392 }
 0x21b   :  { %v2395_v10 = vunpack.i.h.bf16 %v2393_v9  ;;  %v2394_v11 = vunpack.i.l.bf16 %v2393_v9  ;;  %2156 = vmatmul.mubr.msk.f32.vlgmr.msra.gmra.mrb[4].mxu0 %vm207_vm1, %v2718_v31  ;;  %2294 = vmatprep.subr.msk.bf16.mxu0 %vm2749_vm2, %v2292_v7 }
 0x21c   :  { %2297 = vmatpush3.bf16.xpose.msk.msra.mxu0 %vm2749_vm2, %v2292_v7  ;;  %2169 = vmatprep.mubr.msk.f32.mxu0 %vm207_vm1, %v2734_v36 }
 0x21d   :  { %v2298_v14 = vpack.c.bf16 %v2395_v10, %v2394_v11 }
 0x21e   :  { %v2403_v15 = vpop.permute.xlu1 %2402 }
 0x21f   :  { %v2405_v16 = vunpack.i.h.bf16 %v2403_v15  ;;  %v2404_v17 = vunpack.i.l.bf16 %v2403_v15  ;;  %2299 = vmatprep.subr.bf16.mxu1 %v2298_v14 }
 0x220   :  { %2163 = vmatmul.mubr.msk.f32.vlgmr.msra.gmra.mrb[10].mxu1 %vm207_vm1, %v2728_v34 }
 0x221   :  { %v2306_v19 = vpack.c.bf16 %v2405_v16, %v2404_v17  ;;  %2301 = vmatpush3.bf16.msra.mxu1 %v2298_v14 }
 0x222   :  { %2303 = vmatprep.subr.bf16.mxu1 %v2808_v18  ;;  %v2869_v56 = vpop.permute.xlu1 %2407 }
 0x223   :  { %2170 = vmatmul.mubr.msk.f32.vlgmr.msra.gmra.mrb[6].mxu0 %vm207_vm1, %v2738_v37  ;;  %2307 = vmatprep.subr.bf16.mxu0 %v2306_v19 }
 0x224   :  { %2309 = vmatpush3.bf16.msra.mxu0 %v2306_v19 }
 0x282   :  { %v2122_v20 = vpop.f32.mrb[4].mxu1 }
 0x283   :  { %v282_v21 = vpop.f32.mrb[5].mxu1  ;;  %v904_v22 = vsel %vm900_vm3, %v2122_v20, -inf }
 0x284   :  { %905 = vmax.xlane.f32.xlu1 %v904_v22  ;;  %v901_v23 = vsel %vm900_vm3, %v282_v21, -inf }
 0x285   :  { %v2129_v24 = vpop.f32.mrb[0].mxu0  ;;  %902 = vmax.xlane.f32.xlu0 %v901_v23 }
 0x286   :  { %v369_v25 = vpop.f32.mrb[1].mxu0  ;;  %v910_v26 = vsel %vm900_vm3, %v2129_v24, -inf }
 0x287   :  { %v907_v27 = vsel %vm900_vm3, %v369_v25, -inf }
 0x288   :  { %911 = vmax.xlane.f32.xlu1 %v910_v26 }
 0x289   :  { %908 = vmax.xlane.f32.xlu0 %v907_v27 }
 0x2e3   :  { %v2819_v28 = vpop.f32.mrb[6].mxu1 }
 0x2e4   :  { %v2821_v30 = vpop.f32.mrb[7].mxu1  ;;  %v916_v31 = vsel %vm900_vm3, %v2819_v28, -inf }
 0x2e5   :  { %917 = vmax.xlane.f32.xlu0 %v916_v31  ;;  %v913_v37 = vsel %vm900_vm3, %v2821_v30, -inf }
 0x2e6   :  { %v2825_v33 = vpop.f32.mrb[2].mxu0 }
 0x2e7   :  { %v2827_v34 = vpop.f32.mrb[3].mxu0  ;;  %v922_v36 = vsel %vm900_vm3, %v2825_v33, -inf }
 0x2e8   :  { %923 = vmax.xlane.f32.xlu1 %v922_v36  ;;  %v919_v40 = vsel %vm900_vm3, %v2827_v34, -inf }
 0x2e9   :  { %914 = vmax.xlane.f32.xlu0 %v913_v37 }
 0x2eb   :  { %v2833_v39 = vpop.f32.mrb[8].mxu1 }
 0x2ec   :  { %920 = vmax.xlane.f32.xlu1 %v919_v40  ;;  %v2837_v41 = vpop.f32.mrb[9].mxu1  ;;  %v928_v42 = vsel %vm900_vm3, %v2833_v39, -inf }
 0x2ed   :  { %929 = vmax.xlane.f32.xlu0 %v928_v42  ;;  %v925_v46 = vsel %vm900_vm3, %v2837_v41, -inf }
 0x2ee   :  { %v2841_v43 = vpop.f32.mrb[4].mxu0 }
 0x2ef   :  { %v2843_v44 = vpop.f32.mrb[5].mxu0  ;;  %v934_v45 = vsel %vm900_vm3, %v2841_v43, -inf }
 0x2f0   :  { %935 = vmax.xlane.f32.xlu1 %v934_v45  ;;  %v931_v48 = vsel %vm900_vm3, %v2843_v44, -inf }
 0x2f1   :  { %926 = vmax.xlane.f32.xlu0 %v925_v46 }
 0x2f3   :  { %v2849_v47 = vpop.f32.mrb[10].mxu1 }
 0x2f4   :  { %932 = vmax.xlane.f32.xlu1 %v931_v48  ;;  %v2853_v49 = vpop.f32.mrb[11].mxu1  ;;  %v940_v50 = vsel %vm900_vm3, %v2849_v47, -inf }
 0x2f5   :  { %941 = vmax.xlane.f32.xlu0 %v940_v50  ;;  %v937_v54 = vsel %vm900_vm3, %v2853_v49, -inf }
 0x2f6   :  { %v2857_v51 = vpop.f32.mrb[6].mxu0 }
 0x2f7   :  { %v2859_v52 = vpop.f32.mrb[7].mxu0  ;;  %v946_v55 = vsel %vm900_vm3, %v2857_v51, -inf }
 0x2f8   :  { %v943_v53 = vsel %vm900_vm3, %v2859_v52, -inf }
 0x2f9   :  { %944 = vmax.xlane.f32.xlu1 %v943_v53  ;;  %938 = vmax.xlane.f32.xlu0 %v937_v54 }
 0x2fd   :  { %947 = vmax.xlane.f32.xlu0 %v946_v55 }
 0x30a   :  { %2417 = vrot.lane.b32.xlu1 %v2722_v32, %s2598_s10 }
 0x311   :  { %v906_v57 = vpop.xlane.xlu1 %905 }
 0x312   :  { %v903_v58 = vpop.xlane.xlu0 %902  ;;  %v950_v61 = vsub.f32 %v2122_v20, %v906_v57 }
 0x313   :  { %2412 = vrot.lane.b32.xlu0 %v2712_v29, %s2598_s10  ;;  %v949_v59 = vsub.f32 %v282_v21, %v903_v58 }
 0x314   :  { %v967_v1 = vmul.f32 1.442695, %v950_v61 }
 0x315   :  { %v912_v60 = vpop.xlane.xlu1 %911  ;;  %v965_v62 = vmul.f32 1.442695, %v949_v59 }
 0x316   :  { %v952_v63 = vsub.f32 %v2129_v24, %v912_v60  ;;  %v909_v0 = vpop.xlane.xlu0 %908 }
 0x317   :  { %2431 = vpow2.f32 %v965_v62  ;;  %v951_v3 = vsub.f32 %v369_v25, %v909_v0 }
 0x318   :  { %v971_v2 = vmul.f32 1.442695, %v952_v63  ;;  %2433 = vpow2.f32 %v967_v1 }
 0x319   :  { %v969_v32 = vmul.f32 1.442695, %v951_v3 }
 0x31a   :  { %2435 = vpow2.f32 %v971_v2 }
 0x31b   :  { %2437 = vpow2.f32 %v969_v32 }
 0x321   :  { %v2873_v4 = vpop.eup %2431 }
 0x322   :  { %v2875_v5 = vpop.eup %2433  ;;  %v997_v29 = vsel %vm900_vm3, %v2873_v4, 0.0 }
 0x323   :  { %v1000_v8 = vsel %vm900_vm3, %v2875_v5, 0.0 }
 0x324   :  { %v2879_v6 = vpop.eup %2435 }
 0x325   :  { %v1006_v7 = vsel %vm900_vm3, %v2879_v6, 0.0  ;;  %v2885_v9 = vpop.eup %2437 }
 0x326   :  { %v1003_v10 = vsel %vm900_vm3, %v2885_v9, 0.0 }
 0x32e   :  { %998 = vadd.xlane.f32.xlu1 %v997_v29 }
 0x332   :  { %1007 = vadd.xlane.f32.xlu1 %v1006_v7  ;;  %1001 = vadd.xlane.f32.xlu0 %v1000_v8 }
 0x336   :  { %1004 = vadd.xlane.f32.xlu1 %v1003_v10 }
 0x372   :  { %v918_v11 = vpop.xlane.xlu0 %917 }
 0x373   :  { %v954_v12 = vsub.f32 %v2819_v28, %v918_v11 }
 0x375   :  { %v975_v13 = vmul.f32 1.442695, %v954_v12  ;;  %v924_v14 = vpop.xlane.xlu1 %923 }
 0x376   :  { %v956_v15 = vsub.f32 %v2825_v33, %v924_v14  ;;  %v915_v16 = vpop.xlane.xlu0 %914 }
 0x377   :  { %2439 = vpow2.f32 %v975_v13  ;;  %v953_v17 = vsub.f32 %v2821_v30, %v915_v16 }
 0x378   :  { %v979_v19 = vmul.f32 1.442695, %v956_v15 }
 0x379   :  { %v973_v20 = vmul.f32 1.442695, %v953_v17  ;;  %v921_v21 = vpop.xlane.xlu1 %920 }
 0x37a   :  { %2441 = vpow2.f32 %v979_v19  ;;  %v955_v22 = vsub.f32 %v2827_v34, %v921_v21  ;;  %v930_v23 = vpop.xlane.xlu0 %929 }
 0x37b   :  { %2443 = vpow2.f32 %v973_v20  ;;  %v958_v24 = vsub.f32 %v2833_v39, %v930_v23 }
 0x37c   :  { %v977_v25 = vmul.f32 1.442695, %v955_v22 }
 0x37d   :  { %v983_v26 = vmul.f32 1.442695, %v958_v24  ;;  %v936_v27 = vpop.xlane.xlu1 %935 }
 0x37e   :  { %2445 = vpow2.f32 %v977_v25  ;;  %v960_v28 = vsub.f32 %v2841_v43, %v936_v27  ;;  %v927_v31 = vpop.xlane.xlu0 %926  ;;  %v2410_v27 = vunpack.i.h.bf16 %v2869_v56 }
 0x37f   :  { %2447 = vpow2.f32 %v983_v26  ;;  %v957_v30 = vsub.f32 %v2837_v41, %v927_v31 }
 0x380   :  { %v987_v33 = vmul.f32 1.442695, %v960_v28 }
 0x381   :  { %v2896_v36 = vpop.eup %2439  ;;  %v981_v37 = vmul.f32 1.442695, %v957_v30  ;;  %v933_v40 = vpop.xlane.xlu1 %932 }
 0x382   :  { %2449 = vpow2.f32 %v987_v33  ;;  %v959_v34 = vsub.f32 %v2843_v44, %v933_v40  ;;  %v942_v42 = vpop.xlane.xlu0 %941  ;;  %v1012_v39 = vsel %vm900_vm3, %v2896_v36, 0.0 }
 0x383   :  { %2451 = vpow2.f32 %v981_v37  ;;  %v962_v45 = vsub.f32 %v2849_v47, %v942_v42  ;;  %1013 = vadd.xlane.f32.xlu0 %v1012_v39 }
 0x384   :  { %v2902_v43 = vpop.eup %2441  ;;  %v985_v46 = vmul.f32 1.442695, %v959_v34 }
 0x385   :  { %v2904_v41 = vpop.eup %2443  ;;  %v991_v48 = vmul.f32 1.442695, %v962_v45  ;;  %v1018_v50 = vsel %vm900_vm3, %v2902_v43, 0.0 }
 0x386   :  { %2453 = vpow2.f32 %v985_v46  ;;  %v945_v53 = vpop.xlane.xlu1 %944  ;;  %1019 = vadd.xlane.f32.xlu1 %v1018_v50  ;;  %v939_v44 = vpop.xlane.xlu0 %938  ;;  %v1009_v54 = vsel %vm900_vm3, %v2904_v41, 0.0 }
 0x387   :  { %2455 = vpow2.f32 %v991_v48  ;;  %v963_v47 = vsub.f32 %v2859_v52, %v945_v53  ;;  %v961_v55 = vsub.f32 %v2853_v49, %v939_v44  ;;  %1010 = vadd.xlane.f32.xlu0 %v1009_v54 }
 0x388   :  { %v2912_v57 = vpop.eup %2445 }
 0x389   :  { %v2914_v58 = vpop.eup %2447  ;;  %v993_v59 = vmul.f32 1.442695, %v963_v47  ;;  %v989_v60 = vmul.f32 1.442695, %v961_v55  ;;  %v1015_v61 = vsel %vm900_vm3, %v2912_v57, 0.0 }
 0x38a   :  { %1016 = vadd.xlane.f32.xlu1 %v1015_v61  ;;  %v948_v62 = vpop.xlane.xlu0 %947  ;;  %v1024_v63 = vsel %vm900_vm3, %v2914_v58, 0.0  ;;  %v2418_v20 = vpop.permute.xlu1 %2417 }
 0x38b   :  { %2457 = vpow2.f32 %v993_v59  ;;  %v964_v52 = vsub.f32 %v2857_v51, %v948_v62  ;;  %1025 = vadd.xlane.f32.xlu0 %v1024_v63  ;;  %v2420_v37 = vunpack.i.h.bf16 %v2418_v20  ;;  %v2419_v40 = vunpack.i.l.bf16 %v2418_v20 }
 0x38c   :  { %v2921_v49 = vpop.eup %2449  ;;  %2459 = vpow2.f32 %v989_v60 }
 0x38d   :  { %v2923_v0 = vpop.eup %2451  ;;  %v995_v1 = vmul.f32 1.442695, %v964_v52  ;;  %v1030_v2 = vsel %vm900_vm3, %v2921_v49, 0.0 }
 0x38e   :  { %1031 = vadd.xlane.f32.xlu1 %v1030_v2  ;;  %v2413_v3 = vpop.permute.xlu0 %2412  ;;  %v1021_v32 = vsel %vm900_vm3, %v2923_v0, 0.0 }
 0x38f   :  { %2461 = vpow2.f32 %v995_v1  ;;  %v2415_v29 = vunpack.i.h.bf16 %v2413_v3  ;;  %v2414_v7 = vunpack.i.l.bf16 %v2413_v3  ;;  %1022 = vadd.xlane.f32.xlu0 %v1021_v32 }
 0x390   :  { %v2929_v51 = vpop.eup %2453 }
 0x391   :  { %v2931_v8 = vpop.eup %2455  ;;  %v2933_v10 = vpack.c.bf16 %v2415_v29, %v2414_v7  ;;  %v1027_v11 = vsel %vm900_vm3, %v2929_v51, 0.0 }
 0x392   :  { %1028 = vadd.xlane.f32.xlu1 %v1027_v11  ;;  %v1036_v12 = vsel %vm900_vm3, %v2931_v8, 0.0 }
 0x393   :  { %1037 = vadd.xlane.f32.xlu0 %v1036_v12  ;;  %2315 = vmatprep.subr.bf16.mxu0 %v2933_v10 }
 0x395   :  { %v2940_v13 = vpop.eup %2457 }
 0x396   :  { %v2942_v14 = vpop.eup %2459  ;;  %v1039_v15 = vsel %vm900_vm3, %v2940_v13, 0.0 }
 0x397   :  { %1040 = vadd.xlane.f32.xlu1 %v1039_v15  ;;  %v1033_v16 = vsel %vm900_vm3, %v2942_v14, 0.0 }
 0x398   :  { %1034 = vadd.xlane.f32.xlu0 %v1033_v16 }
 0x399   :  { %v2948_v17 = vpop.eup %2461 }
 0x39a   :  { %v1042_v19 = vsel %vm900_vm3, %v2948_v17, 0.0 }
 0x39c   :  { %1043 = vadd.xlane.f32.xlu0 %v1042_v19 }
 0x3a8   :  { %2427 = vrot.lane.b32.xlu1 %v2742_v38, %s2598_s10  ;;  %v2409_v38 = vunpack.i.l.bf16 %v2869_v56  ;;  %v2318_v56 = vpack.c.bf16 %v2420_v37, %v2419_v40 }
 0x3aa   :  { %v2310_v33 = vpack.c.bf16 %v2410_v27, %v2409_v38  ;;  %v1835_v27 = vld [vmem:[#allocation7 + $0x8] sm:$0xff] }
 0x3b2   :  { %2422 = vrot.lane.b32.xlu0 %v2732_v35, %s2598_s10 }
 0x3bb   :  { %v999_v21 = vpop.xlane.xlu1 %998 }
 0x3bc   :  { %2463 = vrcp.f32 %v999_v21 }
 0x3bf   :  { %v1008_v22 = vpop.xlane.xlu1 %1007  ;;  %v1002_v23 = vpop.xlane.xlu0 %1001 }
 0x3c0   :  { %2465 = vrcp.f32 %v1002_v23 }
 0x3c1   :  { %2467 = vrcp.f32 %v1008_v22 }
 0x3c3   :  { %v1005_v24 = vpop.xlane.xlu1 %1004 }
 0x3c4   :  { %2469 = vrcp.f32 %v1005_v24 }
 0x3c6   :  { %v2464_v25 = vpop.eup %2463 }
 0x3c7   :  { %v1061_v26 = vmul.f32 %v2464_v25, %v2873_v4 }
 0x3c9   :  { %2176 = vmatprep.mubr.msk.f32.mxu1 %vm900_vm3, %v1061_v26  ;;  %v1834_v26 = vld [vmem:[#allocation7] sm:$0xff] }
 0x3ca   :  { %v2466_v28 = vpop.eup %2465 }
 0x3cb   :  { %v1062_v35 = vmul.f32 %v2466_v28, %v2875_v5  ;;  %v2468_v31 = vpop.eup %2467  ;;  %v2330_v28 = vpack.c.bf16 %v1835_v27, %v1834_v26 }
 0x3cc   :  { %v1064_v34 = vmul.f32 %v2468_v31, %v2879_v6  ;;  %v1837_v31 = vld [vmem:[#allocation7 + $0x18] sm:$0xff] }
 0x3cd   :  { %2177 = vmatmul.mubr.msk.f32.vlgmr.msra.gmra.mrb[12].mxu1 %vm900_vm3, %v1062_v35  ;;  %v1836_v35 = vld [vmem:[#allocation7 + $0x10] sm:$0xff] }
 0x3ce   :  { %v2470_v30 = vpop.eup %2469  ;;  %2305 = vmatpush3.bf16.msra.mxu1 %v2808_v18 }
 0x3cf   :  { %v1063_v4 = vmul.f32 %v2470_v30, %v2885_v9  ;;  %2311 = vmatprep.subr.bf16.mxu1 %v2310_v33 }
 0x3d1   :  { %2183 = vmatprep.mubr.msk.f32.mxu1 %vm900_vm3, %v1063_v4 }
 0x3d2   :  { %2184 = vmatmul.mubr.msk.f32.vlgmr.msra.gmra.mrb[14].mxu1 %vm900_vm3, %v1064_v34 }
 0x3d3   :  { %2313 = vmatpush3.bf16.msra.mxu1 %v2310_v33 }
 0x3d4   :  { %2319 = vmatprep.subr.bf16.mxu1 %v2318_v56 }
 0x410   :  { %v1014_v5 = vpop.xlane.xlu0 %1013 }
 0x411   :  { %2471 = vrcp.f32 %v1014_v5 }
 0x413   :  { %v1020_v42 = vpop.xlane.xlu1 %1019 }
 0x414   :  { %v1011_v39 = vpop.xlane.xlu0 %1010 }
 0x415   :  { %2473 = vrcp.f32 %v1011_v39 }
 0x416   :  { %2475 = vrcp.f32 %v1020_v42 }
 0x417   :  { %v1017_v45 = vpop.xlane.xlu1 %1016 }
 0x418   :  { %2477 = vrcp.f32 %v1017_v45  ;;  %v1026_v18 = vpop.xlane.xlu0 %1025 }
 0x419   :  { %2479 = vrcp.f32 %v1026_v18 }
 0x41b   :  { %v1032_v9 = vpop.xlane.xlu1 %1031  ;;  %v2472_v46 = vpop.eup %2471 }
 0x41c   :  { %v1023_v6 = vpop.xlane.xlu0 %1022  ;;  %v1066_v47 = vmul.f32 %v2472_v46, %v2896_v36 }
 0x41d   :  { %2481 = vrcp.f32 %v1023_v6 }
 0x41e   :  { %2483 = vrcp.f32 %v1032_v9 }
 0x41f   :  { %v2474_v48 = vpop.eup %2473  ;;  %v1029_v50 = vpop.xlane.xlu1 %1028 }
 0x420   :  { %2485 = vrcp.f32 %v1029_v50  ;;  %v1038_v53 = vpop.xlane.xlu0 %1037  ;;  %v1065_v44 = vmul.f32 %v2474_v48, %v2904_v41  ;;  %v2476_v54 = vpop.eup %2475 }
 0x421   :  { %v1068_v60 = vmul.f32 %v2476_v54, %v2902_v43 }
 0x422   :  { %v2478_v55 = vpop.eup %2477  ;;  %2190 = vmatprep.mubr.msk.f32.mxu0 %vm900_vm3, %v1065_v44 }
 0x423   :  { %2191 = vmatmul.mubr.msk.f32.vlgmr.msra.gmra.mrb[8].mxu0 %vm900_vm3, %v1066_v47  ;;  %v1067_v59 = vmul.f32 %v2478_v55, %v2912_v57  ;;  %v2480_v41 = vpop.eup %2479 }
 0x424   :  { %2317 = vmatpush3.bf16.msra.mxu0 %v2933_v10  ;;  %v1041_v61 = vpop.xlane.xlu1 %1040  ;;  %v1070_v43 = vmul.f32 %v2480_v41, %v2914_v58 }
 0x425   :  { %2487 = vrcp.f32 %v1041_v61  ;;  %v1035_v62 = vpop.xlane.xlu0 %1034  ;;  %2197 = vmatprep.mubr.msk.f32.mxu1 %vm900_vm3, %v1067_v59 }
 0x426   :  { %2489 = vrcp.f32 %v1035_v62  ;;  %2198 = vmatmul.mubr.msk.f32.vlgmr.msra.gmra.mrb[16].mxu1 %vm900_vm3, %v1068_v60 }
 0x427   :  { %v2482_v36 = vpop.eup %2481  ;;  %2491 = vrcp.f32 %v1038_v53  ;;  %2321 = vmatpush3.bf16.msra.mxu1 %v2318_v56 }
 0x428   :  { %v2428_v63 = vpop.permute.xlu1 %2427  ;;  %v1069_v52 = vmul.f32 %v2482_v36, %v2923_v0  ;;  %v2484_v57 = vpop.eup %2483 }
 0x429   :  { %v2430_v1 = vunpack.i.h.bf16 %v2428_v63  ;;  %v2429_v2 = vunpack.i.l.bf16 %v2428_v63  ;;  %v1044_v3 = vpop.xlane.xlu0 %1043  ;;  %v1072_v10 = vmul.f32 %v2484_v57, %v2921_v49 }
 0x42a   :  { %v2486_v32 = vpop.eup %2485  ;;  %2493 = vrcp.f32 %v1044_v3  ;;  %2204 = vmatprep.mubr.msk.f32.mxu0 %vm900_vm3, %v1069_v52 }
 0x42b   :  { %v2326_v29 = vpack.c.bf16 %v2430_v1, %v2429_v2  ;;  %2205 = vmatmul.mubr.msk.f32.vlgmr.msra.gmra.mrb[10].mxu0 %vm900_vm3, %v1070_v43  ;;  %v1071_v7 = vmul.f32 %v2486_v32, %v2929_v51  ;;  %v2017_v2 = vld [vmem:[%s3038_s4] ss:$0 sm:$0xff]  ;;  %s2561_s4 = scalar_lea.vmem %s1952_s16, 512 }
 0x42c   :  { %p2562_p10 = scmp.ne.s32.totalorder %s1952_s16, %s2561_s4  ;;  %p2567_p12 = scmp.lt.s32.totalorder %s2561_s4, %s2561_s4 }
 0x42d   :  { %v2423_v11 = vpop.permute.xlu0 %2422  ;;  %2211 = vmatprep.mubr.msk.f32.mxu1 %vm900_vm3, %v1071_v7  ;;  %2327 = vmatprep.subr.bf16.mxu1 %v2326_v29 }
 0x42e   :  { %v2425_v0 = vunpack.i.h.bf16 %v2423_v11  ;;  %v2424_v58 = vunpack.i.l.bf16 %v2423_v11  ;;  %2212 = vmatmul.mubr.msk.f32.vlgmr.msra.gmra.mrb[18].mxu1 %vm900_vm3, %v1072_v10  ;;  %p2568_p13 = por %p2567_p12, %p2566_p11 }
 0x42f   :  { %v2488_v12 = vpop.eup %2487  ;;  %2329 = vmatpush3.bf16.msra.mxu1 %v2326_v29 }
 0x430   :  { %v2490_v15 = vpop.eup %2489  ;;  %v2322_v16 = vpack.c.bf16 %v2425_v0, %v2424_v58  ;;  %v1075_v19 = vmul.f32 %v2488_v12, %v2940_v13  ;;  %p2569_p0 = pnand %p2568_p13, %p2562_p10 }
 0x431   :  { %v2492_v20 = vpop.eup %2491  ;;  %v1073_v21 = vmul.f32 %v2490_v15, %v2942_v14 }
 0x432   :  { %2323 = vmatprep.subr.bf16.mxu0 %v2322_v16  ;;  %2225 = vmatprep.mubr.msk.f32.mxu1 %vm900_vm3, %v1075_v19  ;;  %v1074_v51 = vmul.f32 %v2492_v20, %v2931_v8  ;;  %v2334_v8 = vpack.c.bf16 %v1837_v31, %v1836_v35 }
 0x433   :  { %2325 = vmatpush3.bf16.msra.mxu0 %v2322_v16  ;;  %2218 = vmatprep.mubr.msk.f32.mxu0 %vm900_vm3, %v1073_v21 }
 0x434   :  { %v2494_v49 = vpop.eup %2493  ;;  %2331 = vmatprep.subr.bf16.mxu0 %v2330_v28 }
 0x435   :  { %v1076_v22 = vmul.f32 %v2494_v49, %v2948_v17 }
 0x436   :  { %2219 = vmatmul.mubr.msk.f32.vlgmr.msra.gmra.mrb[12].mxu0 %vm900_vm3, %v1074_v51 }
 0x437   :  { %2226 = vmatmul.mubr.msk.f32.vlgmr.msra.gmra.mrb[20].mxu1 %vm900_vm3, %v1076_v22  ;;  %2333 = vmatpush3.bf16.msra.mxu0 %v2330_v28 }
 0x438   :  { %2335 = vmatprep.subr.bf16.mxu0 %v2334_v8 }
 0x43b   :  { %2337 = vmatpush3.bf16.msra.mxu0 %v2334_v8 }
 0x4a0   :  { %v2178_v23 = vpop.f32.mrb[12].mxu1 }
 0x4a1   :  { %v1155_v13 = vpop.f32.mrb[13].mxu1 }
 0x4a5   :  { %v2185_v24 = vpop.f32.mrb[14].mxu1 }
 0x4a6   :  { %v1242_v25 = vpop.f32.mrb[15].mxu1 }
 0x4f6   :  { %v2192_v14 = vpop.f32.mrb[8].mxu0 }
 0x4f7   :  { %1779 = vrot.lane.b32.xlu1 %v2192_v14, %s2592_s6  ;;  %v1329_v38 = vpop.f32.mrb[9].mxu0 }
 0x4f8   :  { %1777 = vrot.lane.b32.xlu0 %v1329_v38, %s2592_s6 }
 0x4f9   :  { %v2199_v17 = vpop.f32.mrb[16].mxu1 }
 0x4fa   :  { %v1416_v30 = vpop.f32.mrb[17].mxu1 }
 0x4fb   :  { %1783 = vrot.lane.b32.xlu1 %v2199_v17, %s2592_s6 }
 0x4fc   :  { %1781 = vrot.lane.b32.xlu0 %v1416_v30, %s2592_s6 }
 0x4fe   :  { %v2206_v33 = vpop.f32.mrb[10].mxu0 }
 0x4ff   :  { %1795 = vrot.lane.b32.xlu1 %v2206_v33, %s2599_s11  ;;  %v1503_v37 = vpop.f32.mrb[11].mxu0 }
 0x500   :  { %1793 = vrot.lane.b32.xlu0 %v1503_v37, %s2599_s11 }
 0x501   :  { %v2213_v40 = vpop.f32.mrb[18].mxu1 }
 0x502   :  { %v1590_v4 = vpop.f32.mrb[19].mxu1 }
 0x503   :  { %1799 = vrot.lane.b32.xlu1 %v2213_v40, %s2599_s11 }
 0x504   :  { %1797 = vrot.lane.b32.xlu0 %v1590_v4, %s2599_s11 }
 0x509   :  { %v2220_v34 = vpop.f32.mrb[12].mxu0 }
 0x50a   :  { %v2227_v56 = vpop.f32.mrb[20].mxu1  ;;  %1811 = vrot.lane.b32.xlu1 %v2220_v34, %s2600_s12  ;;  %v1677_v5 = vpop.f32.mrb[13].mxu0 }
 0x50b   :  { %v1764_v42 = vpop.f32.mrb[21].mxu1  ;;  %1809 = vrot.lane.b32.xlu0 %v1677_v5, %s2600_s12 }
 0x50e   :  { %1815 = vrot.lane.b32.xlu1 %v2227_v56, %s2600_s12 }
 0x50f   :  { %1813 = vrot.lane.b32.xlu0 %v1764_v42, %s2600_s12 }
 0x569   :  { %v1780_v39 = vpop.permute.xlu1 %1779 }
 0x56a   :  { %v1778_v45 = vpop.permute.xlu0 %1777  ;;  %v1822_v54 = vsel %vm207_vm1, %v2178_v23, %v1780_v39 }
 0x56b   :  { %v1821_v53 = vsel %vm207_vm1, %v1155_v13, %v1778_v45 }
 0x56d   :  { %v1784_v18 = vpop.permute.xlu1 %1783 }
 0x56e   :  { %v1782_v9 = vpop.permute.xlu0 %1781  ;;  %v1824_v36 = vsel %vm207_vm1, %v2185_v24, %v1784_v18 }
 0x56f   :  { %v1823_v62 = vsel %vm207_vm1, %v1242_v25, %v1782_v9 }
 0x571   :  { %v1796_v6 = vpop.permute.xlu1 %1795 }
 0x572   :  { %v1794_v46 = vpop.permute.xlu0 %1793  ;;  %v1826_v59 = vsel %vm900_vm3, %v1822_v54, %v1796_v6 }
 0x573   :  { %v1825_v47 = vsel %vm900_vm3, %v1821_v53, %v1794_v46 }
 0x575   :  { %v1800_v48 = vpop.permute.xlu1 %1799 }
 0x576   :  { %v1798_v50 = vpop.permute.xlu0 %1797  ;;  %v1828_v57 = vsel %vm900_vm3, %v1824_v36, %v1800_v48 }
 0x577   :  { %v1827_v63 = vsel %vm900_vm3, %v1823_v62, %v1798_v50 }
 0x57c   :  { %v1812_v44 = vpop.permute.xlu1 %1811 }
 0x57d   :  { %v1810_v55 = vpop.permute.xlu0 %1809  ;;  %v1831_v61 = vsel %vm1829_vm4, %v1826_v59, %v1812_v44 }
 0x57e   :  { %v1830_v60 = vsel %vm1829_vm4, %v1825_v47, %v1810_v55 }
 0x57f   :  { %2236 = vmatprep.mubr.msk.f32.mxu0 %vm77_vm0, %v1830_v60 }
 0x580   :  { %v1816_v41 = vpop.permute.xlu1 %1815  ;;  %2237 = vmatmul.mubr.msk.f32.vlgmr.msra.gmra.mrb[14].mxu0 %vm77_vm0, %v1831_v61 }
 0x581   :  { %v1814_v52 = vpop.permute.xlu0 %1813  ;;  %v1833_v1 = vsel %vm1829_vm4, %v1828_v57, %v1816_v41 }
 0x582   :  { %v1832_v43 = vsel %vm1829_vm4, %v1827_v63, %v1814_v52 }
 0x583   :  { %2239 = vmatprep.mubr.msk.f32.mxu0 %vm77_vm0, %v1832_v43 }
 0x584   :  { %2240 = vmatmul.mubr.msk.f32.gmra.mrb[16].mxu0 %vm77_vm0, %v1833_v1 }
 0x653   :  { %v2238_v3 = vpop.f32.mrb[14].mxu0 }
 0x654   :  { %v1929_v32 = vadd.f32 %v2238_v3, %v2017_v2  ;;  %v1923_v29 = vpop.f32.mrb[15].mxu0 }
 0x655   :  { %v1924_v7 = vadd.f32 %v2017_v2, %v1923_v29 }
 0x656   :  { %1943 = vst.msk [vmem:[#allocation8 + $0x8] sm:$0xff] %vm77_vm0, %v1929_v32 }
 0x657   :  { %1942 = vst.msk [vmem:[#allocation8] sm:$0xff] %vm77_vm0, %v1924_v7  ;;  %v2241_v10 = vpop.f32.mrb[16].mxu0 }
 0x658   :  { %v1939_v11 = vadd.f32 %v2241_v10, %v2017_v2  ;;  %v1933_v0 = vpop.f32.mrb[17].mxu0 }
 0x659   :  { %v1934_v58 = vadd.f32 %v2017_v2, %v1933_v0 }
 0x65a   :  { %1945 = vst.msk [vmem:[#allocation8 + $0x18] sm:$0xff] %vm77_vm0, %v1939_v11 }
 0x65b   :  { %1944 = vst.msk [vmem:[#allocation8 + $0x10] sm:$0xff] %vm77_vm0, %v1934_v58 }
 0x65c   :  { %2572 = shalt.err (!%p2569_p0)
}
 0x65d   :  { %s2573_s18 = scalar_lea.hbm %s3039_s5, 512 }
 0x65e   :  { %p2574_p1 = scmp.ne.s32.totalorder %s3039_s5, %s2573_s18  ;;  %p2577_p2 = scmp.lt.u32.totalorder %s2573_s18, %s3039_s5 }
 0x660   :  { %p2579_p3 = pnand %p2577_p2, %p2574_p1 }
 0x662   :  { %2582 = shalt.err (!%p2579_p3)
}
 0x663   :  { %1957 = dma.vmem_to_hbm [thread:$0]  %s1952_s16, 512, %s3039_s5, [#allocation4], %s2591_s30, %s2591_s30, %s2592_s6  }
 0x664   :  { %2587 = dma.done.wait [#allocation4], 512  }
 0x665   :  { %2588 = vsyncadd [#allocation4], 4294966784 }
 0x666   :  { %1961 = vsyncpa [#allocation3], 1 }
 0x667   :  { %1962 = vsyncpa [#allocation6], 1 }
 0x668   :  { %1963 = vsyncpa [#allocation4], 1 }

</bundles_post_ra>
